<compile_context>
chip_gen: v7x
topology: tpu7x:2x2x1
jax: 0.10.0
libtpu: 0.0.40
codegen_flags: <defaults>
</compile_context>

<pallas_src>
import functools

import jax
import jax.numpy as jnp
import numpy as np
from jax.experimental import pallas as pl
from jax.experimental.pallas import tpu as pltpu

BN_EPS = 1e-5

_COMPILER_PARAMS = pltpu.CompilerParams(
    dimension_semantics=("parallel",),        # v7x megacore: images split across TCs
    vmem_limit_bytes=16 * 1024 * 1024)        # tiny footprint; safe on v7x's 64 MiB


# ---------------------------------------------------------------------------
# Fused layer kernel: [prev-layer BN affine + ReLU] -> 3x3 conv -> partial BN stats
# One image per grid step. All tiles are lane-dense (last dim = W*C).
# ---------------------------------------------------------------------------
def _layer_kernel(a_ref, scale_ref, shift_ref, rhs_ref, y_ref, csum_ref, cm2_ref,
                  *, H, W, apply_affine):
    """
    a_ref     : (H+2, W*Cin)        f32  row-halo'd activation slab (prev raw conv out,
                                         or the network input for the first layer)
    scale_ref : (1, W*Cin)          f32  prev layer's fused BN scale (ignored if !apply_affine)
    shift_ref : (1, W*Cin)          f32  prev layer's fused BN shift
    rhs_ref   : (3, W*Cin, W*Cout)  bf16 block-banded conv weights (width halo folded in)
    y_ref     : (H+2, W*Cout)       f32  raw conv output, zero row halo (lane-dense)
    csum_ref  : (1, W*Cout)         f32  per-image, per-(w,c) column sums over h
    cm2_ref   : (1, W*Cout)         f32  per-image, per-(w,c) CENTERED sums of squares
    """
    wcin = a_ref.shape[-1]
    wcout = y_ref.shape[-1]

    a = a_ref[...]                                              # (H+2, W*Cin) f32
    if apply_affine:
        # Previous layer's BN affine + ReLU (f32 — v5e has no bf16 VPU path), then
        # re-zero the halo rows (affine(0)=shift would otherwise corrupt the padding).
        act = jnp.maximum(a * scale_ref[...] + shift_ref[...], 0.0)
        rows = jax.lax.broadcasted_iota(jnp.int32, (H + 2, wcin), 0)
        act = jnp.where((rows >= 1) & (rows <= H), act, 0.0)
    else:
        act = a                                                 # raw input, halo already 0

    # 3x3 conv = 3 row-shifted matmuls against block-banded rhs; bf16 MXU operands,
    # f32 accumulation. (For realistic Cin>=64 switch back to per-tap matmuls with a
    # Cout-tiled output instead of the banded trick.)
    acc = jnp.zeros((H, wcout), jnp.float32)
    for kh in range(3):
        lhs = act[kh:kh + H, :].astype(jnp.bfloat16)            # (H, W*Cin)
        acc += jnp.dot(lhs, rhs_ref[kh], preferred_element_type=jnp.float32)

    # Lane-dense store + explicit zero row halo (kept deterministic in HBM).
    y_ref[1:H + 1, :] = acc
    zrow = jnp.zeros((1, wcout), jnp.float32)
    y_ref[0:1, :] = zrow
    y_ref[H + 1:H + 2, :] = zrow

    # Partial BN statistics, centered per (image, column) group of count H.
    csum = jnp.sum(acc, axis=0, keepdims=True)                  # (1, W*Cout)
    mu = csum * (1.0 / H)
    d = acc - mu
    csum_ref[...] = csum
    cm2_ref[...] = jnp.sum(d * d, axis=0, keepdims=True)


# ---------------------------------------------------------------------------
# Standalone epilogue for the LAST layer only: BN affine + ReLU (lane-dense)
# ---------------------------------------------------------------------------
def _bn_relu_kernel(y_ref, scale_ref, shift_ref, o_ref, *, H):
    o_ref[...] = jnp.maximum(
        y_ref[1:H + 1, :] * scale_ref[...] + shift_ref[...], 0.0
    ).astype(o_ref.dtype)


# ---------------------------------------------------------------------------
# Wrapper-side helpers (tiny arrays, plain JAX)
# ---------------------------------------------------------------------------
def _banded_weights(w, W):
    """(3,3,Cin,Cout) HWIO f32 -> (3, W*Cin, W*Cout) bf16 block-banded matrices.

    R[kh][win*Cin+ci, wout*Cout+co] = w[kh, kw, ci, co] with win = wout + kw - 1
    (zero outside the band) — i.e. the width (kw) taps and the zero width-padding
    are folded into the matmul operand.
    """
    mats = []
    for kh in range(3):
        r = 0.0
        for kw in range(3):
            band = jnp.eye(W, W, k=1 - kw, dtype=jnp.float32)   # win == wout + kw - 1
            r = r + jnp.kron(band, w[kh, kw])
        mats.append(r)
    return jnp.stack(mats, axis=0).astype(jnp.bfloat16)


def _bn_scale_shift(csum, cm2, gamma, beta, *, H, W):
    """Chan-merge per-(image, column) partial stats (count = H each) into per-channel
    mean/var, then return the fused affine tiled to the lane-dense (1, W*Cout) layout."""
    N = csum.shape[0]
    cout = gamma.shape[-1]
    m_g = (csum / H).reshape(N * W, cout)                       # group means
    m2_g = cm2.reshape(N * W, cout)                             # group centered SSQ
    mean = jnp.mean(m_g, axis=0)                                # (Cout,) equal counts
    m2 = jnp.sum(m2_g, axis=0) + H * jnp.sum(jnp.square(m_g - mean), axis=0)
    var = m2 / (N * H * W)                                      # biased (PyTorch BN fwd)
    scale = gamma.reshape(cout) * jax.lax.rsqrt(var + BN_EPS)
    shift = beta.reshape(cout) - mean * scale
    scale_t = jnp.tile(scale.reshape(1, cout), (1, W))          # column w*Cout+c -> c
    shift_t = jnp.tile(shift.reshape(1, cout), (1, W))
    return scale_t, shift_t


def _conv_layer(a_pad, scale_t, shift_t, rhs, *, H, W, apply_affine):
    """a_pad: (N, H+2, W*Cin) f32; rhs: (3, W*Cin, W*Cout) bf16."""
    N = a_pad.shape[0]
    wcin = a_pad.shape[-1]
    wcout = rhs.shape[-1]
    kernel = functools.partial(_layer_kernel, H=H, W=W, apply_affine=apply_affine)
    return pl.pallas_call(
        kernel,
        grid=(N,),
        in_specs=[
            pl.BlockSpec((None, H + 2, wcin), lambda n: (n, 0, 0)),
            pl.BlockSpec((1, wcin), lambda n: (0, 0)),
            pl.BlockSpec((1, wcin), lambda n: (0, 0)),
            pl.BlockSpec((3, wcin, wcout), lambda n: (0, 0, 0)),
        ],
        out_specs=[
            pl.BlockSpec((None, H + 2, wcout), lambda n: (n, 0, 0)),
            pl.BlockSpec((None, 1, wcout), lambda n: (n, 0, 0)),
            pl.BlockSpec((None, 1, wcout), lambda n: (n, 0, 0)),
        ],
        out_shape=[
            jax.ShapeDtypeStruct((N, H + 2, wcout), jnp.float32),
            jax.ShapeDtypeStruct((N, 1, wcout), jnp.float32),
            jax.ShapeDtypeStruct((N, 1, wcout), jnp.float32),
        ],
        compiler_params=_COMPILER_PARAMS,
    )(a_pad, scale_t, shift_t, rhs)


def _bn_relu(y_pad, scale_t, shift_t, *, H):
    N = y_pad.shape[0]
    wcout = y_pad.shape[-1]
    kernel = functools.partial(_bn_relu_kernel, H=H)
    return pl.pallas_call(
        kernel,
        grid=(N,),
        in_specs=[
            pl.BlockSpec((None, H + 2, wcout), lambda n: (n, 0, 0)),
            pl.BlockSpec((1, wcout), lambda n: (0, 0)),
            pl.BlockSpec((1, wcout), lambda n: (0, 0)),
        ],
        out_specs=pl.BlockSpec((None, H, wcout), lambda n: (n, 0, 0)),
        out_shape=jax.ShapeDtypeStruct((N, H, wcout), jnp.float32),
        compiler_params=_COMPILER_PARAMS,
    )(y_pad, scale_t, shift_t)


# ---------------------------------------------------------------------------
# Block module (deterministic synthetic parameters)
# ---------------------------------------------------------------------------
class BlockPallas:
    def __init__(self, layer_num, in_channels, out_channels, key):
        self.params = []
        c_in = in_channels
        for _ in range(layer_num):
            key, kw_, kb_, kg_, kbt_ = jax.random.split(key, 5)
            w = jax.random.normal(kw_, (3, 3, c_in, out_channels),
                                  jnp.float32) * (1.0 / np.sqrt(9 * c_in))
            b = jax.random.normal(kb_, (1, out_channels), jnp.float32) * 0.05
            gamma = 1.0 + 0.1 * jax.random.normal(kg_, (1, out_channels), jnp.float32)
            beta = 0.1 * jax.random.normal(kbt_, (1, out_channels), jnp.float32)
            self.params.append((w, b, gamma, beta))
            c_in = out_channels

    def __call__(self, x_nchw):
        N, C0, H, W = x_nchw.shape
        # NCHW -> lane-dense (N, H, W*C) slab with a zero ROW halo only (the width
        # halo is folded into the banded weights).
        x = jnp.transpose(x_nchw, (0, 2, 3, 1)).reshape(N, H, W * C0)
        a = jnp.pad(x, ((0, 0), (1, 1), (0, 0)))

        scale_t = jnp.zeros((1, W * C0), jnp.float32)    # unused for layer 0
        shift_t = jnp.zeros((1, W * C0), jnp.float32)
        apply_affine = False
        cout = C0
        for (w, b, gamma, beta) in self.params:
            cout = w.shape[-1]
            rhs = _banded_weights(w, W)
            # Conv bias `b` is cancelled exactly by training-mode BN mean subtraction,
            # so the Pallas path never reads it (the reference keeps it and matches).
            y, csum, cm2 = _conv_layer(a, scale_t, shift_t, rhs, H=H, W=W,
                                       apply_affine=apply_affine)
            scale_t, shift_t = _bn_scale_shift(csum, cm2, gamma, beta, H=H, W=W)
            a = y
            apply_affine = True

        out = _bn_relu(a, scale_t, shift_t, H=H)          # (N, H, W*Cout)
        out = out.reshape(N, H, W, cout)
        return jnp.transpose(out, (0, 3, 1, 2))           # NHWC -> NCHW


# ---------------------------------------------------------------------------
# Pure-JAX reference (conv operands rounded to bf16 to mirror the kernel's MXU
# precision; accumulation / BN / ReLU in f32; includes the conv bias).
# ---------------------------------------------------------------------------
def block_reference(x_nchw, params):
    x = jnp.transpose(x_nchw, (0, 2, 3, 1))
    for (w, b, gamma, beta) in params:
        xq = x.astype(jnp.bfloat16).astype(jnp.float32)
        wq = w.astype(jnp.bfloat16).astype(jnp.float32)
        y = jax.lax.conv_general_dilated(
            xq, wq, window_strides=(1, 1), padding=((1, 1), (1, 1)),
            dimension_numbers=("NHWC", "HWIO", "NHWC"))
        y = y + b.reshape(1, 1, 1, -1)
        mean = jnp.mean(y, axis=(0, 1, 2), keepdims=True)
        var = jnp.mean(jnp.square(y - mean), axis=(0, 1, 2), keepdims=True)
        y = (y - mean) * jax.lax.rsqrt(var + BN_EPS)
        y = y * gamma.reshape(1, 1, 1, -1) + beta.reshape(1, 1, 1, -1)
        x = jnp.maximum(y, 0.0)
    return jnp.transpose(x, (0, 3, 1, 2))


if __name__ == "__main__":
    key = jax.random.PRNGKey(0)
    key, k_in, k_par = jax.random.split(key, 3)

    # Block(layer_num=2, in_channels=4, out_channels=8)
    layer_num, in_channels, out_channels = 2, 4, 8
    N, H, W = 2, 16, 16

    x = jax.random.normal(k_in, (N, in_channels, H, W), jnp.float32)   # NCHW

    block = BlockPallas(layer_num, in_channels, out_channels, k_par)

    fwd = jax.jit(lambda inp: block(inp))
    out = jax.block_until_ready(fwd(x))
    assert out.shape == (N, out_channels, H, W), out.shape

    ref = jax.block_until_ready(block_reference(x, block.params))
    # Tolerance accounts for bf16 rounding of the MXU operands (conv/BN/ReLU math
    # itself is f32 in both paths).
    np.testing.assert_allclose(np.asarray(out), np.asarray(ref),
                               rtol=1e-2, atol=1e-2)

    print("KERNEL_OK")
</pallas_src>

<mosaic_0001>
module attributes {stable_mosaic.version = 11 : i64} {
  func.func @_layer_kernel(%arg0: i32, %arg1: memref<1x18x64xf32, #tpu.memory_space<vmem>>, %arg2: memref<1x64xf32, #tpu.memory_space<vmem>>, %arg3: memref<1x64xf32, #tpu.memory_space<vmem>>, %arg4: memref<3x64x128xbf16, #tpu.memory_space<vmem>>, %arg5: memref<1x18x128xf32, #tpu.memory_space<vmem>>, %arg6: memref<1x1x128xf32, #tpu.memory_space<vmem>>, %arg7: memref<1x1x128xf32, #tpu.memory_space<vmem>>) attributes {dimension_semantics = [#tpu.dimension_semantics<parallel>], iteration_bounds = array<i64: 2>, scalar_prefetch = 0 : i64, scratch_operands = 0 : i64, tpu.core_type = #tpu.core_type<tc>, window_params = [{transform_indices = @transform_0, window_bounds = array<i64: 1, 18, 64>}, {pipeline_mode = #tpu.pipeline_mode<synchronous>, transform_indices = @transform_1, window_bounds = array<i64: 1, 64>}, {pipeline_mode = #tpu.pipeline_mode<synchronous>, transform_indices = @transform_2, window_bounds = array<i64: 1, 64>}, {pipeline_mode = #tpu.pipeline_mode<synchronous>, transform_indices = @transform_3, window_bounds = array<i64: 3, 64, 128>}, {transform_indices = @transform_4, window_bounds = array<i64: 1, 18, 128>}, {transform_indices = @transform_5, window_bounds = array<i64: 1, 1, 128>}, {transform_indices = @transform_6, window_bounds = array<i64: 1, 1, 128>}]} {
    %c0 = arith.constant 0 : index
    %c0_0 = arith.constant 0 : index
    %c0_1 = arith.constant 0 : index
    %0 = vector.load %arg1[%c0, %c0_0, %c0_1] : memref<1x18x64xf32, #tpu.memory_space<vmem>>, vector<1x18x64xf32>
    %1 = vector.shape_cast %0 : vector<1x18x64xf32> to vector<18x64xf32>
    %cst = arith.constant 0.000000e+00 : f32
    %2 = vector.broadcast %cst : f32 to vector<16x128xf32>
    %3 = vector.extract_strided_slice %1 {offsets = [0, 0], sizes = [16, 64], strides = [1, 1]} : vector<18x64xf32> to vector<16x64xf32>
    %4 = arith.truncf %3 : vector<16x64xf32> to vector<16x64xbf16>
    %c0_2 = arith.constant 0 : index
    %c0_3 = arith.constant 0 : index
    %c0_4 = arith.constant 0 : index
    %5 = vector.load %arg4[%c0_2, %c0_3, %c0_4] : memref<3x64x128xbf16, #tpu.memory_space<vmem>>, vector<1x64x128xbf16>
    %6 = vector.shape_cast %5 : vector<1x64x128xbf16> to vector<64x128xbf16>
    %cst_5 = arith.constant dense<0.000000e+00> : vector<16x128xf32>
    %7 = tpu.matmul %4, %6, %cst_5 {dimension_numbers = #tpu.dot_dimension_numbers<[1], [0], [0], [1], [0, 0, 1, 1], [], []>} : vector<16x64xbf16>, vector<64x128xbf16>, vector<16x128xf32> -> vector<16x128xf32>
    %8 = arith.addf %2, %7 : vector<16x128xf32>
    %9 = vector.extract_strided_slice %1 {offsets = [1, 0], sizes = [16, 64], strides = [1, 1]} : vector<18x64xf32> to vector<16x64xf32>
    %10 = arith.truncf %9 : vector<16x64xf32> to vector<16x64xbf16>
    %c1 = arith.constant 1 : index
    %c0_6 = arith.constant 0 : index
    %c0_7 = arith.constant 0 : index
    %11 = vector.load %arg4[%c1, %c0_6, %c0_7] : memref<3x64x128xbf16, #tpu.memory_space<vmem>>, vector<1x64x128xbf16>
    %12 = vector.shape_cast %11 : vector<1x64x128xbf16> to vector<64x128xbf16>
    %cst_8 = arith.constant dense<0.000000e+00> : vector<16x128xf32>
    %13 = tpu.matmul %10, %12, %cst_8 {dimension_numbers = #tpu.dot_dimension_numbers<[1], [0], [0], [1], [0, 0, 1, 1], [], []>} : vector<16x64xbf16>, vector<64x128xbf16>, vector<16x128xf32> -> vector<16x128xf32>
    %14 = arith.addf %8, %13 : vector<16x128xf32>
    %15 = vector.extract_strided_slice %1 {offsets = [2, 0], sizes = [16, 64], strides = [1, 1]} : vector<18x64xf32> to vector<16x64xf32>
    %16 = arith.truncf %15 : vector<16x64xf32> to vector<16x64xbf16>
    %c2 = arith.constant 2 : index
    %c0_9 = arith.constant 0 : index
    %c0_10 = arith.constant 0 : index
    %17 = vector.load %arg4[%c2, %c0_9, %c0_10] : memref<3x64x128xbf16, #tpu.memory_space<vmem>>, vector<1x64x128xbf16>
    %18 = vector.shape_cast %17 : vector<1x64x128xbf16> to vector<64x128xbf16>
    %cst_11 = arith.constant dense<0.000000e+00> : vector<16x128xf32>
    %19 = tpu.matmul %16, %18, %cst_11 {dimension_numbers = #tpu.dot_dimension_numbers<[1], [0], [0], [1], [0, 0, 1, 1], [], []>} : vector<16x64xbf16>, vector<64x128xbf16>, vector<16x128xf32> -> vector<16x128xf32>
    %20 = arith.addf %14, %19 : vector<16x128xf32>
    %c0_12 = arith.constant 0 : index
    %c1_13 = arith.constant 1 : index
    %c0_14 = arith.constant 0 : index
    %21 = vector.load %arg5[%c0_12, %c1_13, %c0_14] : memref<1x18x128xf32, #tpu.memory_space<vmem>>, vector<1x16x128xf32>
    %22 = vector.shape_cast %21 : vector<1x16x128xf32> to vector<16x128xf32>
    %23 = vector.shape_cast %20 : vector<16x128xf32> to vector<1x16x128xf32>
    tpu.vector_store %arg5[%c0_12, %c1_13, %c0_14], %23 {strides = array<i32>} : memref<1x18x128xf32, #tpu.memory_space<vmem>>, vector<1x16x128xf32>,
    %cst_15 = arith.constant 0.000000e+00 : f32
    %24 = vector.broadcast %cst_15 : f32 to vector<1x128xf32>
    %c0_16 = arith.constant 0 : index
    %c0_17 = arith.constant 0 : index
    %c0_18 = arith.constant 0 : index
    %25 = vector.load %arg5[%c0_16, %c0_17, %c0_18] : memref<1x18x128xf32, #tpu.memory_space<vmem>>, vector<1x1x128xf32>
    %26 = vector.shape_cast %25 : vector<1x1x128xf32> to vector<1x128xf32>
    %27 = vector.shape_cast %24 : vector<1x128xf32> to vector<1x1x128xf32>
    tpu.vector_store %arg5[%c0_16, %c0_17, %c0_18], %27 {strides = array<i32>} : memref<1x18x128xf32, #tpu.memory_space<vmem>>, vector<1x1x128xf32>,
    %c0_19 = arith.constant 0 : index
    %c17 = arith.constant 17 : index
    %c0_20 = arith.constant 0 : index
    %28 = vector.load %arg5[%c0_19, %c17, %c0_20] : memref<1x18x128xf32, #tpu.memory_space<vmem>>, vector<1x1x128xf32>
    %29 = vector.shape_cast %28 : vector<1x1x128xf32> to vector<1x128xf32>
    %30 = vector.shape_cast %24 : vector<1x128xf32> to vector<1x1x128xf32>
    tpu.vector_store %arg5[%c0_19, %c17, %c0_20], %30 {strides = array<i32>} : memref<1x18x128xf32, #tpu.memory_space<vmem>>, vector<1x1x128xf32>,
    %cst_21 = arith.constant dense<0.000000e+00> : vector<128xf32>
    %31 = vector.multi_reduction <add>, %20, %cst_21 [0] : vector<16x128xf32> to vector<128xf32>
    %32 = vector.shape_cast %31 : vector<128xf32> to vector<1x128xf32>
    %cst_22 = arith.constant 6.250000e-02 : f32
    %33 = vector.broadcast %cst_22 : f32 to vector<1x128xf32>
    %34 = arith.mulf %32, %33 : vector<1x128xf32>
    %35 = vector.broadcast %34 : vector<1x128xf32> to vector<16x128xf32>
    %36 = arith.subf %20, %35 : vector<16x128xf32>
    %c0_23 = arith.constant 0 : index
    %c0_24 = arith.constant 0 : index
    %c0_25 = arith.constant 0 : index
    %37 = vector.load %arg6[%c0_23, %c0_24, %c0_25] : memref<1x1x128xf32, #tpu.memory_space<vmem>>, vector<1x1x128xf32>
    %38 = vector.shape_cast %37 : vector<1x1x128xf32> to vector<1x128xf32>
    %39 = vector.shape_cast %32 : vector<1x128xf32> to vector<1x1x128xf32>
    tpu.vector_store %arg6[%c0_23, %c0_24, %c0_25], %39 {strides = array<i32>} : memref<1x1x128xf32, #tpu.memory_space<vmem>>, vector<1x1x128xf32>,
    %40 = arith.mulf %36, %36 : vector<16x128xf32>
    %cst_26 = arith.constant dense<0.000000e+00> : vector<128xf32>
    %41 = vector.multi_reduction <add>, %40, %cst_26 [0] : vector<16x128xf32> to vector<128xf32>
    %42 = vector.shape_cast %41 : vector<128xf32> to vector<1x128xf32>
    %c0_27 = arith.constant 0 : index
    %c0_28 = arith.constant 0 : index
    %c0_29 = arith.constant 0 : index
    %43 = vector.load %arg7[%c0_27, %c0_28, %c0_29] : memref<1x1x128xf32, #tpu.memory_space<vmem>>, vector<1x1x128xf32>
    %44 = vector.shape_cast %43 : vector<1x1x128xf32> to vector<1x128xf32>
    %45 = vector.shape_cast %42 : vector<1x128xf32> to vector<1x1x128xf32>
    tpu.vector_store %arg7[%c0_27, %c0_28, %c0_29], %45 {strides = array<i32>} : memref<1x1x128xf32, #tpu.memory_space<vmem>>, vector<1x1x128xf32>,
    return
  }
  func.func @transform_0(%arg0: i32) -> (i32, i32, i32) {
    %c0_i32 = arith.constant 0 : i32
    %c0_i32_0 = arith.constant 0 : i32
    %c0_i32_1 = arith.constant 0 : i32
    return %arg0, %c0_i32, %c0_i32_0 : i32, i32, i32
  }
  func.func @transform_1(%arg0: i32) -> (i32, i32) {
    %c0_i32 = arith.constant 0 : i32
    %c0_i32_0 = arith.constant 0 : i32
    %c0_i32_1 = arith.constant 0 : i32
    return %c0_i32, %c0_i32_0 : i32, i32
  }
  func.func @transform_2(%arg0: i32) -> (i32, i32) {
    %c0_i32 = arith.constant 0 : i32
    %c0_i32_0 = arith.constant 0 : i32
    %c0_i32_1 = arith.constant 0 : i32
    return %c0_i32, %c0_i32_0 : i32, i32
  }
  func.func @transform_3(%arg0: i32) -> (i32, i32, i32) {
    %c0_i32 = arith.constant 0 : i32
    %c0_i32_0 = arith.constant 0 : i32
    %c0_i32_1 = arith.constant 0 : i32
    %c0_i32_2 = arith.constant 0 : i32
    return %c0_i32, %c0_i32_0, %c0_i32_1 : i32, i32, i32
  }
  func.func @transform_4(%arg0: i32) -> (i32, i32, i32) {
    %c0_i32 = arith.constant 0 : i32
    %c0_i32_0 = arith.constant 0 : i32
    %c0_i32_1 = arith.constant 0 : i32
    return %arg0, %c0_i32, %c0_i32_0 : i32, i32, i32
  }
  func.func @transform_5(%arg0: i32) -> (i32, i32, i32) {
    %c0_i32 = arith.constant 0 : i32
    %c0_i32_0 = arith.constant 0 : i32
    %c0_i32_1 = arith.constant 0 : i32
    return %arg0, %c0_i32, %c0_i32_0 : i32, i32, i32
  }
  func.func @transform_6(%arg0: i32) -> (i32, i32, i32) {
    %c0_i32 = arith.constant 0 : i32
    %c0_i32_0 = arith.constant 0 : i32
    %c0_i32_1 = arith.constant 0 : i32
    return %arg0, %c0_i32, %c0_i32_0 : i32, i32, i32
  }
}

module attributes {stable_mosaic.version = 11 : i64} {
  func.func @_layer_kernel(%arg0: i32, %arg1: memref<1x18x128xf32, #tpu.memory_space<vmem>>, %arg2: memref<1x128xf32, #tpu.memory_space<vmem>>, %arg3: memref<1x128xf32, #tpu.memory_space<vmem>>, %arg4: memref<3x128x128xbf16, #tpu.memory_space<vmem>>, %arg5: memref<1x18x128xf32, #tpu.memory_space<vmem>>, %arg6: memref<1x1x128xf32, #tpu.memory_space<vmem>>, %arg7: memref<1x1x128xf32, #tpu.memory_space<vmem>>) attributes {dimension_semantics = [#tpu.dimension_semantics<parallel>], iteration_bounds = array<i64: 2>, scalar_prefetch = 0 : i64, scratch_operands = 0 : i64, tpu.core_type = #tpu.core_type<tc>, window_params = [{transform_indices = @transform_0, window_bounds = array<i64: 1, 18, 128>}, {pipeline_mode = #tpu.pipeline_mode<synchronous>, transform_indices = @transform_1, window_bounds = array<i64: 1, 128>}, {pipeline_mode = #tpu.pipeline_mode<synchronous>, transform_indices = @transform_2, window_bounds = array<i64: 1, 128>}, {pipeline_mode = #tpu.pipeline_mode<synchronous>, transform_indices = @transform_3, window_bounds = array<i64: 3, 128, 128>}, {transform_indices = @transform_4, window_bounds = array<i64: 1, 18, 128>}, {transform_indices = @transform_5, window_bounds = array<i64: 1, 1, 128>}, {transform_indices = @transform_6, window_bounds = array<i64: 1, 1, 128>}]} {
    %c0 = arith.constant 0 : index
    %c0_0 = arith.constant 0 : index
    %c0_1 = arith.constant 0 : index
    %0 = vector.load %arg1[%c0, %c0_0, %c0_1] : memref<1x18x128xf32, #tpu.memory_space<vmem>>, vector<1x18x128xf32>
    %1 = vector.shape_cast %0 : vector<1x18x128xf32> to vector<18x128xf32>
    %c0_2 = arith.constant 0 : index
    %c0_3 = arith.constant 0 : index
    %2 = vector.load %arg2[%c0_2, %c0_3] : memref<1x128xf32, #tpu.memory_space<vmem>>, vector<1x128xf32>
    %3 = vector.broadcast %2 : vector<1x128xf32> to vector<18x128xf32>
    %4 = arith.mulf %1, %3 : vector<18x128xf32>
    %c0_4 = arith.constant 0 : index
    %c0_5 = arith.constant 0 : index
    %5 = vector.load %arg3[%c0_4, %c0_5] : memref<1x128xf32, #tpu.memory_space<vmem>>, vector<1x128xf32>
    %6 = vector.broadcast %5 : vector<1x128xf32> to vector<18x128xf32>
    %7 = arith.addf %4, %6 : vector<18x128xf32>
    %cst = arith.constant 0.000000e+00 : f32
    %8 = vector.broadcast %cst : f32 to vector<18x128xf32>
    %9 = arith.maximumf %7, %8 : vector<18x128xf32>
    %10 = tpu.iota {dimensions = array<i32: 0>} : vector<18x128xi32>
    %c1_i32 = arith.constant 1 : i32
    %11 = vector.broadcast %c1_i32 : i32 to vector<18x128xi32>
    %12 = arith.cmpi sge, %10, %11 : vector<18x128xi32>
    %c16_i32 = arith.constant 16 : i32
    %13 = vector.broadcast %c16_i32 : i32 to vector<18x128xi32>
    %14 = arith.cmpi sle, %10, %13 : vector<18x128xi32>
    %15 = arith.andi %12, %14 : vector<18x128xi1>
    %cst_6 = arith.constant 0.000000e+00 : f32
    %16 = vector.broadcast %cst_6 : f32 to vector<18x128xf32>
    %17 = arith.select %15, %9, %16 : vector<18x128xi1>, vector<18x128xf32>
    %cst_7 = arith.constant 0.000000e+00 : f32
    %18 = vector.broadcast %cst_7 : f32 to vector<16x128xf32>
    %19 = vector.extract_strided_slice %17 {offsets = [0, 0], sizes = [16, 128], strides = [1, 1]} : vector<18x128xf32> to vector<16x128xf32>
    %20 = arith.truncf %19 : vector<16x128xf32> to vector<16x128xbf16>
    %c0_8 = arith.constant 0 : index
    %c0_9 = arith.constant 0 : index
    %c0_10 = arith.constant 0 : index
    %21 = vector.load %arg4[%c0_8, %c0_9, %c0_10] : memref<3x128x128xbf16, #tpu.memory_space<vmem>>, vector<1x128x128xbf16>
    %22 = vector.shape_cast %21 : vector<1x128x128xbf16> to vector<128x128xbf16>
    %cst_11 = arith.constant dense<0.000000e+00> : vector<16x128xf32>
    %23 = tpu.matmul %20, %22, %cst_11 {dimension_numbers = #tpu.dot_dimension_numbers<[1], [0], [0], [1], [0, 0, 1, 1], [], []>} : vector<16x128xbf16>, vector<128x128xbf16>, vector<16x128xf32> -> vector<16x128xf32>
    %24 = arith.addf %18, %23 : vector<16x128xf32>
    %25 = vector.extract_strided_slice %17 {offsets = [1, 0], sizes = [16, 128], strides = [1, 1]} : vector<18x128xf32> to vector<16x128xf32>
    %26 = arith.truncf %25 : vector<16x128xf32> to vector<16x128xbf16>
    %c1 = arith.constant 1 : index
    %c0_12 = arith.constant 0 : index
    %c0_13 = arith.constant 0 : index
    %27 = vector.load %arg4[%c1, %c0_12, %c0_13] : memref<3x128x128xbf16, #tpu.memory_space<vmem>>, vector<1x128x128xbf16>
    %28 = vector.shape_cast %27 : vector<1x128x128xbf16> to vector<128x128xbf16>
    %cst_14 = arith.constant dense<0.000000e+00> : vector<16x128xf32>
    %29 = tpu.matmul %26, %28, %cst_14 {dimension_numbers = #tpu.dot_dimension_numbers<[1], [0], [0], [1], [0, 0, 1, 1], [], []>} : vector<16x128xbf16>, vector<128x128xbf16>, vector<16x128xf32> -> vector<16x128xf32>
    %30 = arith.addf %24, %29 : vector<16x128xf32>
    %31 = vector.extract_strided_slice %17 {offsets = [2, 0], sizes = [16, 128], strides = [1, 1]} : vector<18x128xf32> to vector<16x128xf32>
    %32 = arith.truncf %31 : vector<16x128xf32> to vector<16x128xbf16>
    %c2 = arith.constant 2 : index
    %c0_15 = arith.constant 0 : index
    %c0_16 = arith.constant 0 : index
    %33 = vector.load %arg4[%c2, %c0_15, %c0_16] : memref<3x128x128xbf16, #tpu.memory_space<vmem>>, vector<1x128x128xbf16>
    %34 = vector.shape_cast %33 : vector<1x128x128xbf16> to vector<128x128xbf16>
    %cst_17 = arith.constant dense<0.000000e+00> : vector<16x128xf32>
    %35 = tpu.matmul %32, %34, %cst_17 {dimension_numbers = #tpu.dot_dimension_numbers<[1], [0], [0], [1], [0, 0, 1, 1], [], []>} : vector<16x128xbf16>, vector<128x128xbf16>, vector<16x128xf32> -> vector<16x128xf32>
    %36 = arith.addf %30, %35 : vector<16x128xf32>
    %c0_18 = arith.constant 0 : index
    %c1_19 = arith.constant 1 : index
    %c0_20 = arith.constant 0 : index
    %37 = vector.load %arg5[%c0_18, %c1_19, %c0_20] : memref<1x18x128xf32, #tpu.memory_space<vmem>>, vector<1x16x128xf32>
    %38 = vector.shape_cast %37 : vector<1x16x128xf32> to vector<16x128xf32>
    %39 = vector.shape_cast %36 : vector<16x128xf32> to vector<1x16x128xf32>
    tpu.vector_store %arg5[%c0_18, %c1_19, %c0_20], %39 {strides = array<i32>} : memref<1x18x128xf32, #tpu.memory_space<vmem>>, vector<1x16x128xf32>,
    %cst_21 = arith.constant 0.000000e+00 : f32
    %40 = vector.broadcast %cst_21 : f32 to vector<1x128xf32>
    %c0_22 = arith.constant 0 : index
    %c0_23 = arith.constant 0 : index
    %c0_24 = arith.constant 0 : index
    %41 = vector.load %arg5[%c0_22, %c0_23, %c0_24] : memref<1x18x128xf32, #tpu.memory_space<vmem>>, vector<1x1x128xf32>
    %42 = vector.shape_cast %41 : vector<1x1x128xf32> to vector<1x128xf32>
    %43 = vector.shape_cast %40 : vector<1x128xf32> to vector<1x1x128xf32>
    tpu.vector_store %arg5[%c0_22, %c0_23, %c0_24], %43 {strides = array<i32>} : memref<1x18x128xf32, #tpu.memory_space<vmem>>, vector<1x1x128xf32>,
    %c0_25 = arith.constant 0 : index
    %c17 = arith.constant 17 : index
    %c0_26 = arith.constant 0 : index
    %44 = vector.load %arg5[%c0_25, %c17, %c0_26] : memref<1x18x128xf32, #tpu.memory_space<vmem>>, vector<1x1x128xf32>
    %45 = vector.shape_cast %44 : vector<1x1x128xf32> to vector<1x128xf32>
    %46 = vector.shape_cast %40 : vector<1x128xf32> to vector<1x1x128xf32>
    tpu.vector_store %arg5[%c0_25, %c17, %c0_26], %46 {strides = array<i32>} : memref<1x18x128xf32, #tpu.memory_space<vmem>>, vector<1x1x128xf32>,
    %cst_27 = arith.constant dense<0.000000e+00> : vector<128xf32>
    %47 = vector.multi_reduction <add>, %36, %cst_27 [0] : vector<16x128xf32> to vector<128xf32>
    %48 = vector.shape_cast %47 : vector<128xf32> to vector<1x128xf32>
    %cst_28 = arith.constant 6.250000e-02 : f32
    %49 = vector.broadcast %cst_28 : f32 to vector<1x128xf32>
    %50 = arith.mulf %48, %49 : vector<1x128xf32>
    %51 = vector.broadcast %50 : vector<1x128xf32> to vector<16x128xf32>
    %52 = arith.subf %36, %51 : vector<16x128xf32>
    %c0_29 = arith.constant 0 : index
    %c0_30 = arith.constant 0 : index
    %c0_31 = arith.constant 0 : index
    %53 = vector.load %arg6[%c0_29, %c0_30, %c0_31] : memref<1x1x128xf32, #tpu.memory_space<vmem>>, vector<1x1x128xf32>
    %54 = vector.shape_cast %53 : vector<1x1x128xf32> to vector<1x128xf32>
    %55 = vector.shape_cast %48 : vector<1x128xf32> to vector<1x1x128xf32>
    tpu.vector_store %arg6[%c0_29, %c0_30, %c0_31], %55 {strides = array<i32>} : memref<1x1x128xf32, #tpu.memory_space<vmem>>, vector<1x1x128xf32>,
    %56 = arith.mulf %52, %52 : vector<16x128xf32>
    %cst_32 = arith.constant dense<0.000000e+00> : vector<128xf32>
    %57 = vector.multi_reduction <add>, %56, %cst_32 [0] : vector<16x128xf32> to vector<128xf32>
    %58 = vector.shape_cast %57 : vector<128xf32> to vector<1x128xf32>
    %c0_33 = arith.constant 0 : index
    %c0_34 = arith.constant 0 : index
    %c0_35 = arith.constant 0 : index
    %59 = vector.load %arg7[%c0_33, %c0_34, %c0_35] : memref<1x1x128xf32, #tpu.memory_space<vmem>>, vector<1x1x128xf32>
    %60 = vector.shape_cast %59 : vector<1x1x128xf32> to vector<1x128xf32>
    %61 = vector.shape_cast %58 : vector<1x128xf32> to vector<1x1x128xf32>
    tpu.vector_store %arg7[%c0_33, %c0_34, %c0_35], %61 {strides = array<i32>} : memref<1x1x128xf32, #tpu.memory_space<vmem>>, vector<1x1x128xf32>,
    return
  }
  func.func @transform_0(%arg0: i32) -> (i32, i32, i32) {
    %c0_i32 = arith.constant 0 : i32
    %c0_i32_0 = arith.constant 0 : i32
    %c0_i32_1 = arith.constant 0 : i32
    return %arg0, %c0_i32, %c0_i32_0 : i32, i32, i32
  }
  func.func @transform_1(%arg0: i32) -> (i32, i32) {
    %c0_i32 = arith.constant 0 : i32
    %c0_i32_0 = arith.constant 0 : i32
    %c0_i32_1 = arith.constant 0 : i32
    return %c0_i32, %c0_i32_0 : i32, i32
  }
  func.func @transform_2(%arg0: i32) -> (i32, i32) {
    %c0_i32 = arith.constant 0 : i32
    %c0_i32_0 = arith.constant 0 : i32
    %c0_i32_1 = arith.constant 0 : i32
    return %c0_i32, %c0_i32_0 : i32, i32
  }
  func.func @transform_3(%arg0: i32) -> (i32, i32, i32) {
    %c0_i32 = arith.constant 0 : i32
    %c0_i32_0 = arith.constant 0 : i32
    %c0_i32_1 = arith.constant 0 : i32
    %c0_i32_2 = arith.constant 0 : i32
    return %c0_i32, %c0_i32_0, %c0_i32_1 : i32, i32, i32
  }
  func.func @transform_4(%arg0: i32) -> (i32, i32, i32) {
    %c0_i32 = arith.constant 0 : i32
    %c0_i32_0 = arith.constant 0 : i32
    %c0_i32_1 = arith.constant 0 : i32
    return %arg0, %c0_i32, %c0_i32_0 : i32, i32, i32
  }
  func.func @transform_5(%arg0: i32) -> (i32, i32, i32) {
    %c0_i32 = arith.constant 0 : i32
    %c0_i32_0 = arith.constant 0 : i32
    %c0_i32_1 = arith.constant 0 : i32
    return %arg0, %c0_i32, %c0_i32_0 : i32, i32, i32
  }
  func.func @transform_6(%arg0: i32) -> (i32, i32, i32) {
    %c0_i32 = arith.constant 0 : i32
    %c0_i32_0 = arith.constant 0 : i32
    %c0_i32_1 = arith.constant 0 : i32
    return %arg0, %c0_i32, %c0_i32_0 : i32, i32, i32
  }
}

module attributes {stable_mosaic.version = 11 : i64} {
  func.func @_bn_relu_kernel(%arg0: i32, %arg1: memref<1x18x128xf32, #tpu.memory_space<vmem>>, %arg2: memref<1x128xf32, #tpu.memory_space<vmem>>, %arg3: memref<1x128xf32, #tpu.memory_space<vmem>>, %arg4: memref<1x16x128xf32, #tpu.memory_space<vmem>>) attributes {dimension_semantics = [#tpu.dimension_semantics<parallel>], iteration_bounds = array<i64: 2>, scalar_prefetch = 0 : i64, scratch_operands = 0 : i64, tpu.core_type = #tpu.core_type<tc>, window_params = [{transform_indices = @transform_0, window_bounds = array<i64: 1, 18, 128>}, {pipeline_mode = #tpu.pipeline_mode<synchronous>, transform_indices = @transform_1, window_bounds = array<i64: 1, 128>}, {pipeline_mode = #tpu.pipeline_mode<synchronous>, transform_indices = @transform_2, window_bounds = array<i64: 1, 128>}, {transform_indices = @transform_3, window_bounds = array<i64: 1, 16, 128>}]} {
    %c0 = arith.constant 0 : index
    %c1 = arith.constant 1 : index
    %c0_0 = arith.constant 0 : index
    %0 = vector.load %arg1[%c0, %c1, %c0_0] : memref<1x18x128xf32, #tpu.memory_space<vmem>>, vector<1x16x128xf32>
    %1 = vector.shape_cast %0 : vector<1x16x128xf32> to vector<16x128xf32>
    %c0_1 = arith.constant 0 : index
    %c0_2 = arith.constant 0 : index
    %2 = vector.load %arg2[%c0_1, %c0_2] : memref<1x128xf32, #tpu.memory_space<vmem>>, vector<1x128xf32>
    %3 = vector.broadcast %2 : vector<1x128xf32> to vector<16x128xf32>
    %4 = arith.mulf %1, %3 : vector<16x128xf32>
    %c0_3 = arith.constant 0 : index
    %c0_4 = arith.constant 0 : index
    %5 = vector.load %arg3[%c0_3, %c0_4] : memref<1x128xf32, #tpu.memory_space<vmem>>, vector<1x128xf32>
    %6 = vector.broadcast %5 : vector<1x128xf32> to vector<16x128xf32>
    %7 = arith.addf %4, %6 : vector<16x128xf32>
    %cst = arith.constant 0.000000e+00 : f32
    %8 = vector.broadcast %cst : f32 to vector<16x128xf32>
    %9 = arith.maximumf %7, %8 : vector<16x128xf32>
    %c0_5 = arith.constant 0 : index
    %c0_6 = arith.constant 0 : index
    %c0_7 = arith.constant 0 : index
    %10 = vector.load %arg4[%c0_5, %c0_6, %c0_7] : memref<1x16x128xf32, #tpu.memory_space<vmem>>, vector<1x16x128xf32>
    %11 = vector.shape_cast %10 : vector<1x16x128xf32> to vector<16x128xf32>
    %12 = vector.shape_cast %9 : vector<16x128xf32> to vector<1x16x128xf32>
    tpu.vector_store %arg4[%c0_5, %c0_6, %c0_7], %12 {strides = array<i32>} : memref<1x16x128xf32, #tpu.memory_space<vmem>>, vector<1x16x128xf32>,
    return
  }
  func.func @transform_0(%arg0: i32) -> (i32, i32, i32) {
    %c0_i32 = arith.constant 0 : i32
    %c0_i32_0 = arith.constant 0 : i32
    %c0_i32_1 = arith.constant 0 : i32
    return %arg0, %c0_i32, %c0_i32_0 : i32, i32, i32
  }
  func.func @transform_1(%arg0: i32) -> (i32, i32) {
    %c0_i32 = arith.constant 0 : i32
    %c0_i32_0 = arith.constant 0 : i32
    %c0_i32_1 = arith.constant 0 : i32
    return %c0_i32, %c0_i32_0 : i32, i32
  }
  func.func @transform_2(%arg0: i32) -> (i32, i32) {
    %c0_i32 = arith.constant 0 : i32
    %c0_i32_0 = arith.constant 0 : i32
    %c0_i32_1 = arith.constant 0 : i32
    return %c0_i32, %c0_i32_0 : i32, i32
  }
  func.func @transform_3(%arg0: i32) -> (i32, i32, i32) {
    %c0_i32 = arith.constant 0 : i32
    %c0_i32_0 = arith.constant 0 : i32
    %c0_i32_1 = arith.constant 0 : i32
    return %arg0, %c0_i32, %c0_i32_0 : i32, i32, i32
  }
}

</mosaic_0001>

<bundles_post_ra>
// kernel: _lambda_.3
= control target key start
LH: loop header
LB: loop body
LE: loop exit
PB: predicated region body
PF: predicated region fallthrough
CT: control target
= control target key end

     0   :  { %s821_s21 = smov 0   ;;  %s912_s0 = inlined_call_operand.vmem [shape: f32[2,18,64], index: 0, kind: input, shape index: {}]   ;;  %s913_s1 = inlined_call_operand.vmem [shape: f32[1,64], index: 1, kind: input, shape index: {}, may-alias: {1,2}]   ;;  %s914_s2 = inlined_call_operand.vmem [shape: f32[1,64], index: 2, kind: input, shape index: {}, may-alias: {1,2}]   ;;  %s915_s3 = inlined_call_operand.vmem [shape: bf16[3,64,128], index: 3, kind: input, shape index: {}]   ;;  %s916_s4 = inlined_call_operand.vmem [shape: f32[2,18,128], index: 4, kind: output, shape index: {0}]   ;;  %s917_s5 = inlined_call_operand.vmem [shape: f32[2,1,128], index: 5, kind: output, shape index: {1}]   ;;  %s918_s6 = inlined_call_operand.vmem [shape: f32[2,1,128], index: 6, kind: output, shape index: {2}]  }
   0x1 LB: > { %s656_s1 = sadd.s32 4294967295, %s782_s21   ;;  %p660_p0 = scmp.ge.s32.totalorder %s782_s21, 1  ;;  %s782_s21 = sphi %s821_s21, %s17_s21  }
   0x2   : > { %p217_p1 = scmp.lt.s32.totalorder %s782_s21, 3 }
   0x4   : > { %p218_p2 = pnand %p660_p0, %p217_p1 }
   0x5   : > { %v764_v0 = vld [vmem:[%s915_s3] sm:$0xff] (!%p218_p2)   ;;  %v784_v1 = vmov (!%p218_p2), 0.0   ;;  %v765_v2 = vld [vmem:[%s915_s3 + $0x8] sm:$0xff] (!%p218_p2)   ;;  %vm785_vm0 = vmmov (!%p218_p2), 0   ;;  %p253_p3 = scmp.lt.s32.totalorder (!%p218_p2), %s656_s1, 1  ;;  %v766_v4 = vld [vmem:[%s915_s3 + $0x10] sm:$0xff] (!%p218_p2)  }
   0x6   : > { %221 = sbr.rel (%p218_p2) target bundleno = 289 (0x121), region = 36  ;;  %723 = vmatprep.subr.bf16.mxu0 (!%p218_p2), %v784_v1  ;;  %711 = vmatprep.subr.bf16.mxu1 (!%p218_p2), %v784_v1  ;;  %v768_v3 = vld [vmem:[%s915_s3 + $0x20] sm:$0xff] (!%p218_p2)   ;;  %v770_v5 = vld [vmem:[%s915_s3 + $0x28] sm:$0xff] (!%p218_p2)   ;;  %v767_v6 = vld [vmem:[%s915_s3 + $0x18] sm:$0xff] (!%p218_p2)   ;;  %vm329_vm1 = vcmask (!%p218_p2), 523264   ;;  %vm452_vm3 = vcmask (!%p218_p2), 1046528  }
   0x7   : > { %724 = vmatpush3.bf16.msra.mxu0 (!%p218_p2), %v764_v0  ;;  %731 = vmatprep.mubr.msk.bf16.mxu0 (!%p218_p2), %vm785_vm0, %v784_v1  ;;  %v772_v10 = vld [vmem:[%s915_s3 + $0x30] sm:$0xff] (!%p218_p2)   ;;  %v769_v15 = vld [vmem:[%s915_s3 + $0x40] sm:$0xff] (!%p218_p2)   ;;  %v774_v16 = vld [vmem:[%s915_s3 + $0x38] sm:$0xff] (!%p218_p2)   ;;  %vm292_vm2 = vsmask.f32 (!%p218_p2), 7424 }
   0x8   : > { %725 = vmatprep.subr.bf16.mxu0 (!%p218_p2), %v784_v1  ;;  %719 = vmatprep.mubr.msk.bf16.mxu1 (!%p218_p2), %vm785_vm0, %v784_v1  ;;  %v771_v21 = vld [vmem:[%s915_s3 + $0x48] sm:$0xff] (!%p218_p2)   ;;  %v773_v23 = vld [vmem:[%s915_s3 + $0x50] sm:$0xff] (!%p218_p2)   ;;  %v775_v24 = vld [vmem:[%s915_s3 + $0x58] sm:$0xff] (!%p218_p2)  }
   0x9   : > { %712 = vmatpush3.bf16.msra.mxu1 (!%p218_p2), %v768_v3 }
   0xa   : > { %713 = vmatprep.subr.bf16.mxu1 (!%p218_p2), %v784_v1 }
   0xb   : > { %726 = vmatpush3.bf16.msra.mxu0 (!%p218_p2), %v765_v2 }
   0xc   : > { %727 = vmatprep.subr.bf16.mxu0 (!%p218_p2), %v784_v1 }
   0xd   : > { %s920_s1 = smov (!%p253_p3, %s656_s1), 1  ;;  %714 = vmatpush3.bf16.msra.mxu1 %v770_v5 }
   0xe   : > { %s753_s29 = smul.u32 24, %s920_s1  ;;  %715 = vmatprep.subr.bf16.mxu1 %v784_v1  ;;  %s265_s30 = scalar_lea.vmem %s917_s5, %s920_s1 }
   0xf   : > { %728 = vmatpush3.bf16.msra.mxu0 %v766_v4  ;;  %s268_s9 = scalar_lea.vmem %s918_s6, %s920_s1 }
  0x10   : > { %s257_s12 = scalar_lea.vmem %s912_s0, %s753_s29  ;;  %729 = vmatprep.subr.bf16.mxu0 %v784_v1  ;;  %s262_s27 = scalar_lea.vmem %s916_s4, %s753_s29 }
  0x11   : > { %v270_v7 = vld [vmem:[%s257_s12] sm:$0xff]  ;;  %v271_v8 = vld [vmem:[%s257_s12 + $0x8] sm:$0xff]  ;;  %v272_v11 = vld [vmem:[%s257_s12 + $0x10] sm:$0x3]  ;;  %716 = vmatpush3.bf16.msra.mxu1 %v772_v10  ;;  %528 = vst [vmem:[%s262_s27] sm:$0x1] %v784_v1 }
  0x12   : > { %v273_v9 = vpack.c.bf16 %v271_v8, %v270_v7  ;;  %v282_v12 = vpack.c.bf16 %v272_v11, %v272_v11  ;;  %717 = vmatprep.subr.bf16.mxu1 %v784_v1  ;;  %529 = vst [vmem:[%s262_s27 + $0x11] sm:$0x1] %v784_v1 }
  0x13   : > { %730 = vmatpush3.bf16.msra.mxu0 %v767_v6 }
  0x14   : > { %v294_v13 = vshrl.u32 %v273_v9, 16  ;;  %v296_v14 = vshll.u32 %v273_v9, 16  ;;  %v301_v18 = vshll.u32 %v282_v12, 16  ;;  %735 = vmatprep.subr.bf16.mxu0 %v784_v1  ;;  %v453_v25 = vrot.slane %v273_v9, 1 }
  0x15   : > { %718 = vmatpush3.bf16.msra.mxu1 %v774_v16  ;;  %v454_v26 = vrot.slane %v282_v12, 1 }
  0x16   : > { %v298_v17 = vrot.slane %v296_v14, 1  ;;  %v303_v20 = vrot.slane %v301_v18, 1  ;;  %732 = vmatmul.mubr.msk.bf16.vlgmr.msra.gmra.mrb[0].mxu0 %vm329_vm1, %v273_v9 }
  0x17   : > { %736 = vmatpush3.bf16.msra.mxu0 %v769_v15  ;;  %743 = vmatprep.mubr.msk.bf16.mxu0 %vm785_vm0, %v784_v1  ;;  %v455_v27 = vsel %vm452_vm3, %v453_v25, %v454_v26 }
  0x18   : > { %v299_v19 = vor.u32 %v298_v17, %v294_v13  ;;  %737 = vmatprep.subr.bf16.mxu0 %v784_v1 }
  0x1a   : > { %v304_v22 = vsel %vm292_vm2, %v299_v19, %v303_v20 }
  0x1b   : > { %720 = vmatmul.mubr.msk.bf16.vlgmr.msra.gmra.mrb[0].mxu1 %vm329_vm1, %v304_v22  ;;  %738 = vmatpush3.bf16.msra.mxu0 %v771_v21 }
  0x1c   : > { %739 = vmatprep.subr.bf16.mxu0 %v784_v1 }
  0x1f   : > { %740 = vmatpush3.bf16.msra.mxu0 %v773_v23 }
  0x20   : > { %741 = vmatprep.subr.bf16.mxu0 %v784_v1 }
  0x23   : > { %742 = vmatpush3.bf16.msra.mxu0 %v775_v24 }
  0x26   : > { %744 = vmatmul.mubr.msk.bf16.vlgmr.msra.gmra.mrb[0].mxu0 %vm329_vm1, %v455_v27 }
  0xee   : > { %v367_v28 = vpop.f32.mrb[0].mxu1 }
  0xef   : > { %v721_v29 = vpop.f32.mrb[1].mxu1 }
  0xf0   : > { %v370_v30 = vpop.f32.mrb[2].mxu1 }
  0xf1   : > { %v722_v31 = vpop.f32.mrb[3].mxu1 }
  0xf9   : > { %v517_v32 = vpop.f32.mrb[0].mxu0 }
  0xfa   : > { %v747_v33 = vadd.f32 %v517_v32, %v367_v28  ;;  %v745_v34 = vpop.f32.mrb[1].mxu0 }
  0xfb   : > { %v520_v35 = vpop.f32.mrb[2].mxu0 }
  0xfc   : > { %526 = vst [vmem:[%s262_s27 + $0x1] sm:$0xff] %v747_v33  ;;  %v748_v36 = vadd.f32 %v520_v35, %v370_v30  ;;  %v746_v37 = vpop.f32.mrb[3].mxu0 }
  0xfe   : > { %527 = vst [vmem:[%s262_s27 + $0x9] sm:$0xff] %v748_v36  ;;  %v530_v38 = vadd.f32 %v748_v36, %v747_v33 }
 0x100   : > { %v531_v39 = vrot.slane %v530_v38, 4 }
 0x102   : > { %v532_v40 = vadd.f32 %v531_v39, %v530_v38 }
 0x104   : > { %v533_v41 = vrot.slane %v532_v40, 2 }
 0x106   : > { %v534_v42 = vadd.f32 %v533_v41, %v532_v40 }
 0x108   : > { %v535_v43 = vrot.slane %v534_v42, 1 }
 0x10a   : > { %v536_v44 = vadd.f32 %v535_v43, %v534_v42 }
 0x10c   : > { %v537_v45 = vmul.f32 0.0625, %v536_v44  ;;  %540 = vst [vmem:[%s265_s30] sm:$0x1] %v536_v44 }
 0x10e   : > { %v538_v46 = vsub.f32 %v747_v33, %v537_v45  ;;  %v539_v47 = vsub.f32 %v748_v36, %v537_v45 }
 0x110   : > { %v541_v48 = vmul.f32 %v538_v46, %v538_v46  ;;  %v542_v49 = vmul.f32 %v539_v47, %v539_v47 }
 0x112   : > { %v543_v50 = vadd.f32 %v542_v49, %v541_v48 }
 0x114   : > { %v544_v51 = vrot.slane %v543_v50, 4 }
 0x116   : > { %v545_v52 = vadd.f32 %v544_v51, %v543_v50 }
 0x118   : > { %v546_v53 = vrot.slane %v545_v52, 2 }
 0x11a   : > { %v547_v54 = vadd.f32 %v546_v53, %v545_v52 }
 0x11c   : > { %v548_v55 = vrot.slane %v547_v54, 1 }
 0x11e   : > { %v549_v56 = vadd.f32 %v548_v55, %v547_v54 }
 0x120   : > { %550 = vst [vmem:[%s268_s9] sm:$0x1] %v549_v56 }
 0x121 PF: > { %s17_s21 = sadd.s32 1, %s782_s21  }
 0x122   : > { %p14_p4 = scmp.ge.s32.totalorder %s17_s21, 4  }
 0x124   :  { %16 = sbr.rel (!%p14_p4) target bundleno = 1 (0x1), region = 92 }

// kernel: _lambda_.4
= control target key start
LH: loop header
LB: loop body
LE: loop exit
PB: predicated region body
PF: predicated region fallthrough
CT: control target
= control target key end

     0   :  { %s1029_s21 = smov 0   ;;  %s1183_s0 = inlined_call_operand.vmem [shape: f32[2,18,128], index: 0, kind: input, shape index: {}]   ;;  %s1184_s1 = inlined_call_operand.vmem [shape: f32[1,128], index: 1, kind: input, shape index: {}]   ;;  %s1185_s2 = inlined_call_operand.vmem [shape: f32[1,128], index: 2, kind: input, shape index: {}]   ;;  %s1186_s3 = inlined_call_operand.vmem [shape: bf16[3,128,128], index: 3, kind: input, shape index: {}]   ;;  %s1187_s4 = inlined_call_operand.vmem [shape: f32[2,18,128], index: 4, kind: output, shape index: {0}]   ;;  %s1188_s5 = inlined_call_operand.vmem [shape: f32[2,1,128], index: 5, kind: output, shape index: {1}]   ;;  %s1189_s6 = inlined_call_operand.vmem [shape: f32[2,1,128], index: 6, kind: output, shape index: {2}]  }
   0x1 LB: > { %s784_s22 = sadd.s32 4294967295, %s989_s21   ;;  %p788_p0 = scmp.ge.s32.totalorder %s989_s21, 1  ;;  %s989_s21 = sphi %s1029_s21, %s17_s21  }
   0x2   : > { %p217_p1 = scmp.lt.s32.totalorder %s989_s21, 3 }
   0x4   : > { %p218_p2 = pnand %p788_p0, %p217_p1 }
   0x5   : > { %v959_v0 = vld [vmem:[%s1186_s3] sm:$0xff] (!%p218_p2)   ;;  %v991_v1 = vmov (!%p218_p2), 0.0   ;;  %v960_v2 = vld [vmem:[%s1186_s3 + $0x8] sm:$0xff] (!%p218_p2)   ;;  %vm992_vm0 = vmmov (!%p218_p2), 0   ;;  %p253_p3 = scmp.lt.s32.totalorder (!%p218_p2), %s784_s22, 1  ;;  %v961_v3 = vld [vmem:[%s1186_s3 + $0x10] sm:$0xff] (!%p218_p2)   ;;  %v296_v11 = vlaneseq (!%p218_p2) }
   0x6   : > { %221 = sbr.rel (%p218_p2) target bundleno = 321 (0x141), region = 36  ;;  %901 = vmatprep.subr.bf16.mxu0 (!%p218_p2), %v991_v1  ;;  %881 = vmatprep.subr.bf16.mxu1 (!%p218_p2), %v991_v1  ;;  %v967_v4 = vld [vmem:[%s1186_s3 + $0x40] sm:$0xff] (!%p218_p2)   ;;  %v962_v8 = vld [vmem:[%s1186_s3 + $0x18] sm:$0xff] (!%p218_p2)   ;;  %v969_v13 = vld [vmem:[%s1186_s3 + $0x48] sm:$0xff] (!%p218_p2)   ;;  %vm993_vm3 = vmmov (!%p218_p2), 1   ;;  %vm558_vm6 = vcmask (!%p218_p2), 1046528  }
   0x7   : > { %902 = vmatpush3.bf16.msra.mxu0 (!%p218_p2), %v959_v0  ;;  %917 = vmatprep.mubr.msk.bf16.mxu0 (!%p218_p2), %vm992_vm0, %v991_v1  ;;  %v791_v7 = vld [vmem:[%s1184_s1] ss:$0 sm:$0xff] (!%p218_p2)  ;;  %v297_v16 = vshrl.u32 (!%p218_p2), %v296_v11, 7  ;;  %v971_v17 = vld [vmem:[%s1186_s3 + $0x50] sm:$0xff] (!%p218_p2)   ;;  %v964_v19 = vld [vmem:[%s1186_s3 + $0x28] sm:$0xff] (!%p218_p2)  }
   0x8   : > { %903 = vmatprep.subr.bf16.mxu0 (!%p218_p2), %v991_v1  ;;  %897 = vmatprep.mubr.msk.bf16.mxu1 (!%p218_p2), %vm992_vm0, %v991_v1  ;;  %v792_v10 = vld [vmem:[%s1185_s2] ss:$0 sm:$0xff] (!%p218_p2)  ;;  %v973_v21 = vld [vmem:[%s1186_s3 + $0x58] sm:$0xff] (!%p218_p2)   ;;  %v965_v24 = vld [vmem:[%s1186_s3 + $0x30] sm:$0xff] (!%p218_p2)   ;;  %vm347_vm5 = vsmask.f32 (!%p218_p2), 7424 }
   0x9   : > { %882 = vmatpush3.bf16.msra.mxu1 (!%p218_p2), %v967_v4  ;;  %v963_v15 = vld [vmem:[%s1186_s3 + $0x20] sm:$0xff] (!%p218_p2)   ;;  %vm300_vm1 = vcmp.ge.s32.totalorder (!%p218_p2), %v297_v16, 1  ;;  %v299_v27 = vadd.s32 (!%p218_p2), 16, %v297_v16  ;;  %v966_v30 = vld [vmem:[%s1186_s3 + $0x38] sm:$0xff] (!%p218_p2)   ;;  %v977_v31 = vld [vmem:[%s1186_s3 + $0x68] sm:$0xff] (!%p218_p2)  }
   0xa   : > { %883 = vmatprep.subr.bf16.mxu1 (!%p218_p2), %v991_v1  ;;  %v975_v26 = vld [vmem:[%s1186_s3 + $0x60] sm:$0xff] (!%p218_p2)   ;;  %vm825_vm4 = vmpackc.low (!%p218_p2), %vm993_vm3, %vm300_vm1  ;;  %v979_v37 = vld [vmem:[%s1186_s3 + $0x70] sm:$0xff] (!%p218_p2)  }
   0xb   : > { %904 = vmatpush3.bf16.msra.mxu0 (!%p218_p2), %v960_v2  ;;  %vm305_vm2 = vcmp.le.s32.totalorder (!%p218_p2), %v299_v27, 16  ;;  %v968_v36 = vld [vmem:[%s1186_s3 + $0x80] sm:$0xff] (!%p218_p2)   ;;  %v970_v42 = vld [vmem:[%s1186_s3 + $0x88] sm:$0xff] (!%p218_p2)   ;;  %v981_v43 = vld [vmem:[%s1186_s3 + $0x78] sm:$0xff] (!%p218_p2)  }
   0xc   : > { %905 = vmatprep.subr.bf16.mxu0 (!%p218_p2), %v991_v1  ;;  %v972_v47 = vld [vmem:[%s1186_s3 + $0x90] sm:$0xff] (!%p218_p2)   ;;  %v974_v49 = vld [vmem:[%s1186_s3 + $0x98] sm:$0xff] (!%p218_p2)   ;;  %v976_v50 = vld [vmem:[%s1186_s3 + $0xa0] sm:$0xff] (!%p218_p2)  }
   0xd   : > { %s1191_s22 = smov (!%p253_p3, %s784_s22), 1  ;;  %884 = vmatpush3.bf16.msra.mxu1 %v969_v13  ;;  %v978_v51 = vld [vmem:[%s1186_s3 + $0xa8] sm:$0xff]   ;;  %v980_v52 = vld [vmem:[%s1186_s3 + $0xb0] sm:$0xff]   ;;  %v982_v53 = vld [vmem:[%s1186_s3 + $0xb8] sm:$0xff]  }
   0xe   : > { %s947_s29 = smul.u32 24, %s1191_s22  ;;  %885 = vmatprep.subr.bf16.mxu1 %v991_v1  ;;  %s265_s17 = scalar_lea.vmem %s1188_s5, %s1191_s22 }
   0xf   : > { %906 = vmatpush3.bf16.msra.mxu0 %v961_v3  ;;  %s268_s20 = scalar_lea.vmem %s1189_s6, %s1191_s22 }
  0x10   : > { %s1065_s10 = scalar_lea.vmem %s1183_s0, %s947_s29  ;;  %907 = vmatprep.subr.bf16.mxu0 %v991_v1  ;;  %s262_s15 = scalar_lea.vmem %s1187_s4, %s947_s29 }
  0x11   : > { %v270_v5 = vld [vmem:[%s1065_s10] sm:$0xff]  ;;  %v271_v6 = vld [vmem:[%s1065_s10 + $0x8] sm:$0xff]  ;;  %886 = vmatpush3.bf16.msra.mxu1 %v971_v17  ;;  %v272_v28 = vld [vmem:[%s1065_s10 + $0x10] sm:$0x3]  ;;  %656 = vst [vmem:[%s262_s15] sm:$0x1] %v991_v1 }
  0x12   : > { %v280_v9 = vmul.f32 %v791_v7, %v270_v5  ;;  %v281_v12 = vmul.f32 %v791_v7, %v271_v6  ;;  %887 = vmatprep.subr.bf16.mxu1 %v991_v1  ;;  %v282_v29 = vmul.f32 %v791_v7, %v272_v28  ;;  %657 = vst [vmem:[%s262_s15 + $0x11] sm:$0x1] %v991_v1 }
  0x13   : > { %908 = vmatpush3.bf16.msra.mxu0 %v962_v8 }
  0x14   : > { %v290_v14 = vadd.f32 %v792_v10, %v280_v9  ;;  %909 = vmatprep.subr.bf16.mxu0 %v991_v1  ;;  %v291_v18 = vadd.f32 %v792_v10, %v281_v12  ;;  %v292_v33 = vadd.f32 %v792_v10, %v282_v29 }
  0x15   : > { %888 = vmatpush3.bf16.msra.mxu1 %v973_v21 }
  0x16   : > { %v293_v20 = vmax.f32 %v290_v14, 0.0  ;;  %v294_v23 = vmax.f32 %v291_v18, 0.0  ;;  %889 = vmatprep.subr.bf16.mxu1 %v991_v1  ;;  %v295_v35 = vmax.f32 %v292_v33, 0.0 }
  0x17   : > { %910 = vmatpush3.bf16.msra.mxu0 %v963_v15 }
  0x18   : > { %911 = vmatprep.subr.bf16.mxu0 %v991_v1  ;;  %v309_v22 = vsel %vm300_vm1, %v293_v20, 0.0  ;;  %v826_v34 = vpack.c.bf16 %v294_v23, %v293_v20  ;;  %v311_v40 = vsel %vm305_vm2, %v295_v35, 0.0 }
  0x19   : > { %v1103_v25 = vpack.c.bf16 %v294_v23, %v309_v22  ;;  %890 = vmatpush3.bf16.msra.mxu1 %v975_v26  ;;  %v329_v41 = vpack.c.bf16 %v311_v40, %v311_v40 }
  0x1a   : > { %891 = vmatprep.subr.bf16.mxu1 %v991_v1 }
  0x1b   : > { %912 = vmatpush3.bf16.msra.mxu0 %v964_v19  ;;  %v351_v32 = vshll.u32 %v1103_v25, 16  ;;  %v349_v38 = vshrl.u32 %v1103_v25, 16  ;;  %v356_v45 = vshll.u32 %v329_v41, 16  ;;  %v559_v54 = vrot.slane %v1103_v25, 1 }
  0x1c   : > { %913 = vmatprep.subr.bf16.mxu0 %v991_v1  ;;  %v560_v55 = vrot.slane %v329_v41, 1 }
  0x1d   : > { %892 = vmatpush3.bf16.msra.mxu1 %v977_v31  ;;  %v353_v39 = vrot.slane %v351_v32, 1  ;;  %v358_v46 = vrot.slane %v356_v45, 1 }
  0x1e   : > { %893 = vmatprep.subr.bf16.mxu1 %v991_v1  ;;  %v561_v56 = vsel %vm558_vm6, %v559_v54, %v560_v55 }
  0x1f   : > { %914 = vmatpush3.bf16.msra.mxu0 %v965_v24  ;;  %v354_v44 = vor.u32 %v353_v39, %v349_v38 }
  0x20   : > { %915 = vmatprep.subr.bf16.mxu0 %v991_v1 }
  0x21   : > { %894 = vmatpush3.bf16.msra.mxu1 %v979_v37  ;;  %v359_v48 = vsel %vm347_vm5, %v354_v44, %v358_v46 }
  0x22   : > { %895 = vmatprep.subr.bf16.mxu1 %v991_v1 }
  0x23   : > { %916 = vmatpush3.bf16.msra.mxu0 %v966_v30 }
  0x24   : > { %921 = vmatprep.subr.bf16.mxu0 %v991_v1 }
  0x25   : > { %896 = vmatpush3.bf16.msra.mxu1 %v981_v43 }
  0x26   : > { %918 = vmatmul.mubr.msk.bf16.vlgmr.msra.gmra.mrb[0].mxu0 %vm825_vm4, %v826_v34 }
  0x27   : > { %922 = vmatpush3.bf16.msra.mxu0 %v968_v36  ;;  %937 = vmatprep.mubr.msk.bf16.mxu0 %vm992_vm0, %v991_v1 }
  0x28   : > { %923 = vmatprep.subr.bf16.mxu0 %v991_v1  ;;  %898 = vmatmul.mubr.bf16.vlgmr.msra.gmra.mrb[0].mxu1 %v359_v48 }
  0x2b   : > { %924 = vmatpush3.bf16.msra.mxu0 %v970_v42 }
  0x2c   : > { %925 = vmatprep.subr.bf16.mxu0 %v991_v1 }
  0x2f   : > { %926 = vmatpush3.bf16.msra.mxu0 %v972_v47 }
  0x30   : > { %927 = vmatprep.subr.bf16.mxu0 %v991_v1 }
  0x33   : > { %928 = vmatpush3.bf16.msra.mxu0 %v974_v49 }
  0x34   : > { %929 = vmatprep.subr.bf16.mxu0 %v991_v1 }
  0x37   : > { %930 = vmatpush3.bf16.msra.mxu0 %v976_v50 }
  0x38   : > { %931 = vmatprep.subr.bf16.mxu0 %v991_v1 }
  0x3b   : > { %932 = vmatpush3.bf16.msra.mxu0 %v978_v51 }
  0x3c   : > { %933 = vmatprep.subr.bf16.mxu0 %v991_v1 }
  0x3f   : > { %934 = vmatpush3.bf16.msra.mxu0 %v980_v52 }
  0x40   : > { %935 = vmatprep.subr.bf16.mxu0 %v991_v1 }
  0x43   : > { %936 = vmatpush3.bf16.msra.mxu0 %v982_v53 }
  0x46   : > { %938 = vmatmul.mubr.bf16.vlgmr.msra.gmra.mrb[0].mxu0 %v561_v56 }
  0xfb   : > { %v443_v57 = vpop.f32.mrb[0].mxu1 }
  0xfc   : > { %v899_v58 = vpop.f32.mrb[1].mxu1 }
  0xfd   : > { %v446_v59 = vpop.f32.mrb[2].mxu1 }
  0xfe   : > { %v900_v60 = vpop.f32.mrb[3].mxu1 }
 0x119   : > { %v645_v61 = vpop.f32.mrb[0].mxu0 }
 0x11a   : > { %v941_v62 = vadd.f32 %v645_v61, %v443_v57  ;;  %v939_v63 = vpop.f32.mrb[1].mxu0 }
 0x11b   : > { %v648_v0 = vpop.f32.mrb[2].mxu0 }
 0x11c   : > { %654 = vst [vmem:[%s262_s15 + $0x1] sm:$0xff] %v941_v62  ;;  %v942_v2 = vadd.f32 %v648_v0, %v446_v59  ;;  %v940_v3 = vpop.f32.mrb[3].mxu0 }
 0x11e   : > { %655 = vst [vmem:[%s262_s15 + $0x9] sm:$0xff] %v942_v2  ;;  %v658_v4 = vadd.f32 %v942_v2, %v941_v62 }
 0x120   : > { %v659_v5 = vrot.slane %v658_v4, 4 }
 0x122   : > { %v660_v6 = vadd.f32 %v659_v5, %v658_v4 }
 0x124   : > { %v661_v7 = vrot.slane %v660_v6, 2 }
 0x126   : > { %v662_v8 = vadd.f32 %v661_v7, %v660_v6 }
 0x128   : > { %v663_v1 = vrot.slane %v662_v8, 1 }
 0x12a   : > { %v664_v9 = vadd.f32 %v663_v1, %v662_v8 }
 0x12c   : > { %v665_v10 = vmul.f32 0.0625, %v664_v9  ;;  %668 = vst [vmem:[%s265_s17] sm:$0x1] %v664_v9 }
 0x12e   : > { %v666_v11 = vsub.f32 %v941_v62, %v665_v10  ;;  %v667_v12 = vsub.f32 %v942_v2, %v665_v10 }
 0x130   : > { %v669_v13 = vmul.f32 %v666_v11, %v666_v11  ;;  %v670_v14 = vmul.f32 %v667_v12, %v667_v12 }
 0x132   : > { %v671_v15 = vadd.f32 %v670_v14, %v669_v13 }
 0x134   : > { %v672_v16 = vrot.slane %v671_v15, 4 }
 0x136   : > { %v673_v17 = vadd.f32 %v672_v16, %v671_v15 }
 0x138   : > { %v674_v18 = vrot.slane %v673_v17, 2 }
 0x13a   : > { %v675_v19 = vadd.f32 %v674_v18, %v673_v17 }
 0x13c   : > { %v676_v20 = vrot.slane %v675_v19, 1 }
 0x13e   : > { %v677_v21 = vadd.f32 %v676_v20, %v675_v19 }
 0x140   : > { %678 = vst [vmem:[%s268_s20] sm:$0x1] %v677_v21 }
 0x141 PF: > { %s17_s21 = sadd.s32 1, %s989_s21  }
 0x142   : > { %p14_p4 = scmp.ge.s32.totalorder %s17_s21, 4  }
 0x144   :  { %16 = sbr.rel (!%p14_p4) target bundleno = 1 (0x1), region = 92 }

// kernel: _lambda_.5
= control target key start
LH: loop header
LB: loop body
LE: loop exit
PB: predicated region body
PF: predicated region fallthrough
CT: control target
= control target key end

     0   :  { %s300_s12 = smov 0   ;;  %s317_s0 = inlined_call_operand.vmem [shape: f32[2,18,128], index: 0, kind: input, shape index: {}]   ;;  %s318_s1 = inlined_call_operand.vmem [shape: f32[1,128], index: 1, kind: input, shape index: {}]   ;;  %s319_s2 = inlined_call_operand.vmem [shape: f32[1,128], index: 2, kind: input, shape index: {}]   ;;  %s320_s3 = inlined_call_operand.vmem [shape: f32[2,16,128], index: 3, kind: output, shape index: {}]  }
   0x1 LB: > { %s250_s13 = sadd.s32 4294967295, %s278_s12   ;;  %p254_p0 = scmp.ge.s32.totalorder %s278_s12, 1  ;;  %s278_s12 = sphi %s300_s12, %s13_s12  }
   0x2   : > { %p137_p1 = scmp.lt.s32.totalorder %s278_s12, 3 }
   0x4   : > { %p138_p2 = pnand %p254_p0, %p137_p1 }
   0x5   : > { %p161_p3 = scmp.lt.s32.totalorder (!%p138_p2), %s250_s13, 1  ;;  %v258_v0 = vld [vmem:[%s318_s1] ss:$0 sm:$0xff] (!%p138_p2) }
   0x6   : > { %141 = sbr.rel (%p138_p2) target bundleno = 25 (0x19), region = 32  ;;  %v259_v2 = vld [vmem:[%s319_s2] ss:$0 sm:$0xff] (!%p138_p2) }
   0xd   : > { %s322_s13 = smov (!%p161_p3, %s250_s13), 1 }
   0xe   : > { %s263_s14 = smul.u32 24, %s322_s13  ;;  %s262_s22 = sshll.u32 %s322_s13, 4 }
   0xf   : > { %s170_s25 = scalar_lea.vmem %s320_s3, %s262_s22 }
  0x10   : > { %s165_s19 = scalar_lea.vmem %s317_s0, %s263_s14 }
  0x11   : > { %v171_v1 = vld [vmem:[%s165_s19 + $0x1] sm:$0xff]  ;;  %v172_v3 = vld [vmem:[%s165_s19 + $0x9] sm:$0xff] }
  0x12   : > { %v180_v4 = vmul.f32 %v258_v0, %v171_v1  ;;  %v181_v5 = vmul.f32 %v258_v0, %v172_v3 }
  0x14   : > { %v189_v6 = vadd.f32 %v259_v2, %v180_v4  ;;  %v190_v7 = vadd.f32 %v259_v2, %v181_v5 }
  0x16   : > { %v191_v8 = vmax.f32 %v189_v6, 0.0  ;;  %v192_v9 = vmax.f32 %v190_v7, 0.0 }
  0x18   : > { %193 = vst [vmem:[%s170_s25] sm:$0xff] %v191_v8  ;;  %194 = vst [vmem:[%s170_s25 + $0x8] sm:$0xff] %v192_v9 }
  0x19 PF: > { %s13_s12 = sadd.s32 1, %s278_s12  }
  0x1a   : > { %p10_p4 = scmp.ge.s32.totalorder %s13_s12, 4  }
  0x1c   :  { %12 = sbr.rel (!%p10_p4) target bundleno = 1 (0x1), region = 62 }

</bundles_post_ra>
